<compile_context>
chip_gen: v7x
topology: tpu7x:2x2x1
jax: 0.10.0
libtpu: 0.0.40
codegen_flags: <defaults>
</compile_context>

<pallas_src>
import functools

import jax
import jax.numpy as jnp
from jax.experimental import pallas as pl
from jax.experimental.pallas import tpu as pltpu

LINEAR_SIZE = 16   # hidden width from the module
LANE = 128         # TPU lane width

# Lane-tile cap. VMEM budget at tn=32768 (f32, sublane-padded 2->8 and 1->8,
# double-buffered): input 2*8*32768*4 B = 2 MiB, output 2*8*32768*4 B = 2 MiB,
# weights negligible -> ~4 MiB total. That is far under the scoped VMEM default
# on every generation (16 MiB v5e, 32 MiB v6e/v7x) and under v7x's 64 MiB
# physical VMEM, so no vmem_limit_bytes override is needed.
TILE_CAP = 32768


def _round_up(v, m):
    return ((v + m - 1) // m) * m


def _mlp_kernel(x_ref, w1_ref, w2_ref, w3_ref, o_ref):
    # x_ref:  (2, tn)   coordinate tile, batch on the lane axis
    # w1_ref: (16, 2)   in_proj.weight   (PyTorch (out, in) layout, as-is)
    # w2_ref: (16, 16)  linear.weight
    # w3_ref: (16, 1)   out_proj.weight, transposed once in the wrapper
    # o_ref:  (1, tn)   lane-dense output tile
    x = x_ref[...]
    w1 = w1_ref[...]

    # Layer 1 (K=2) on the VPU: two lane-broadcast multiply-adds instead of a
    # skinny MXU matmul (avoids a dependent MXU push/pop round-trip).
    h = w1[:, 0:1] * x[0:1, :] + w1[:, 1:2] * x[1:2, :]           # (16, tn)
    h = jnp.maximum(h, 0.0)                                       # ReLU (a1)

    # Layer 2 (16x16): the FLOP-dominant layer, on the MXU. f32 operands keep
    # the 1e-5 reference tolerance.
    h = jnp.dot(w2_ref[...], h, preferred_element_type=jnp.float32)
    h = jnp.maximum(h, 0.0)                                       # ReLU (a2)

    # Layer 3 (M=1) on the VPU + XLU: scale the 16 hidden rows, then reduce
    # over sublanes. Stays off the MXU and overlaps with layer-2 traffic.
    o_ref[...] = jnp.sum(w3_ref[...] * h, axis=0,
                         keepdims=True).astype(o_ref.dtype)


@functools.partial(jax.jit, static_argnames=("tn",))
def quine_image_approx_forward(x, w_in, w_hidden, w_out, *, tn=None):
    """x: (N, 2) fp32; weights in PyTorch (out, in) layout. Returns (N, 1)."""
    n = x.shape[0]
    n_pad = _round_up(n, LANE)        # pad only to the lane width, not to tn

    if tn is None:
        if n_pad <= TILE_CAP:
            tn = n_pad                # single tile, single grid step
        else:
            # Fewest tiles under the cap, rounded to an even step count so a
            # 2-TensorCore chip (v7x) shards the 'parallel' grid evenly.
            steps = _round_up(pl.cdiv(n_pad, TILE_CAP), 2)
            tn = _round_up(pl.cdiv(n_pad, steps), LANE)
    tn = _round_up(min(tn, n_pad), LANE)

    grid = (pl.cdiv(n_pad, tn),)

    # Single transpose+pad pass (fused under this jit). Zero columns feed the
    # lane padding and are sliced off below. If tn does not divide n_pad, the
    # last grid tile is ragged: its out-of-bounds lanes read unspecified data,
    # which never crosses lanes inside the kernel (no lane-axis reductions) and
    # its out-of-bounds output lanes are masked / sliced off.
    xT = jnp.pad(x.T, ((0, 0), (0, n_pad - n)))                   # (2, n_pad)

    out = pl.pallas_call(
        _mlp_kernel,
        out_shape=jax.ShapeDtypeStruct((1, n_pad), x.dtype),
        grid_spec=pl.GridSpec(
            grid=grid,
            in_specs=[
                pl.BlockSpec((2, tn), lambda i: (0, i)),                     # x
                pl.BlockSpec((LINEAR_SIZE, 2), lambda i: (0, 0)),            # w1
                pl.BlockSpec((LINEAR_SIZE, LINEAR_SIZE), lambda i: (0, 0)),  # w2
                pl.BlockSpec((LINEAR_SIZE, 1), lambda i: (0, 0)),            # w3^T
            ],
            out_specs=pl.BlockSpec((1, tn), lambda i: (0, i)),
        ),
        compiler_params=pltpu.CompilerParams(
            dimension_semantics=("parallel",)),
    )(xT, w_in, w_hidden, w_out.T)

    # (1, n_pad) -> (N, 1), dropping padded columns.
    return out[0, :n].reshape(n, 1)


def reference_forward(x, w_in, w_hidden, w_out):
    h = jnp.maximum(x @ w_in.T, 0.0)
    h = jnp.maximum(h @ w_hidden.T, 0.0)
    return h @ w_out.T


if __name__ == "__main__":
    key = jax.random.PRNGKey(0)
    k_in, k_hid, k_out = jax.random.split(key, 3)

    # Deterministic parameter init (shapes match nn.Linear(out, in), no bias).
    w_in = jax.random.uniform(k_in, (LINEAR_SIZE, 2), jnp.float32,
                              minval=-(2 ** -0.5), maxval=2 ** -0.5)
    w_hidden = jax.random.uniform(k_hid, (LINEAR_SIZE, LINEAR_SIZE), jnp.float32,
                                  minval=-(LINEAR_SIZE ** -0.5),
                                  maxval=LINEAR_SIZE ** -0.5)
    w_out = jax.random.uniform(k_out, (1, LINEAR_SIZE), jnp.float32,
                               minval=-(LINEAR_SIZE ** -0.5),
                               maxval=LINEAR_SIZE ** -0.5)

    # Coordinate grid for a 16x16 "image": 256 (row, col) pairs in [0, 1).
    side = 16
    rows = jnp.repeat(jnp.arange(side, dtype=jnp.float32), side) / side
    cols = jnp.tile(jnp.arange(side, dtype=jnp.float32), side) / side
    x = jnp.stack([rows, cols], axis=-1)                          # (256, 2)

    out = quine_image_approx_forward(x, w_in, w_hidden, w_out)
    out = jax.block_until_ready(out)

    ref = reference_forward(x, w_in, w_hidden, w_out)
    assert out.shape == (side * side, 1)
    assert jnp.allclose(out, ref, atol=1e-5, rtol=1e-5), "mismatch vs reference"

    print("KERNEL_OK")
</pallas_src>

<mosaic_0001>
module attributes {stable_mosaic.version = 11 : i64} {
  func.func @_mlp_kernel(%arg0: i32, %arg1: memref<2x256xf32, #tpu.memory_space<vmem>>, %arg2: memref<16x2xf32, #tpu.memory_space<vmem>>, %arg3: memref<16x16xf32, #tpu.memory_space<vmem>>, %arg4: memref<16x1xf32, #tpu.memory_space<vmem>>, %arg5: memref<1x256xf32, #tpu.memory_space<vmem>>) attributes {dimension_semantics = [#tpu.dimension_semantics<parallel>], iteration_bounds = array<i64: 1>, scalar_prefetch = 0 : i64, scratch_operands = 0 : i64, tpu.core_type = #tpu.core_type<tc>, window_params = [{transform_indices = @transform_0, window_bounds = array<i64: 2, 256>}, {pipeline_mode = #tpu.pipeline_mode<synchronous>, transform_indices = @transform_1, window_bounds = array<i64: 16, 2>}, {pipeline_mode = #tpu.pipeline_mode<synchronous>, transform_indices = @transform_2, window_bounds = array<i64: 16, 16>}, {pipeline_mode = #tpu.pipeline_mode<synchronous>, transform_indices = @transform_3, window_bounds = array<i64: 16, 1>}, {transform_indices = @transform_4, window_bounds = array<i64: 1, 256>}]} {
    %c0 = arith.constant 0 : index
    %c0_0 = arith.constant 0 : index
    %0 = vector.load %arg1[%c0, %c0_0] : memref<2x256xf32, #tpu.memory_space<vmem>>, vector<2x256xf32>
    %c0_1 = arith.constant 0 : index
    %c0_2 = arith.constant 0 : index
    %1 = vector.load %arg2[%c0_1, %c0_2] : memref<16x2xf32, #tpu.memory_space<vmem>>, vector<16x2xf32>
    %2 = vector.extract_strided_slice %1 {offsets = [0, 0], sizes = [16, 1], strides = [1, 1]} : vector<16x2xf32> to vector<16x1xf32>
    %3 = vector.extract_strided_slice %0 {offsets = [0, 0], sizes = [1, 256], strides = [1, 1]} : vector<2x256xf32> to vector<1x256xf32>
    %4 = vector.broadcast %2 : vector<16x1xf32> to vector<16x256xf32>
    %5 = vector.broadcast %3 : vector<1x256xf32> to vector<16x256xf32>
    %6 = arith.mulf %4, %5 : vector<16x256xf32>
    %7 = vector.extract_strided_slice %1 {offsets = [0, 1], sizes = [16, 1], strides = [1, 1]} : vector<16x2xf32> to vector<16x1xf32>
    %8 = vector.extract_strided_slice %0 {offsets = [1, 0], sizes = [1, 256], strides = [1, 1]} : vector<2x256xf32> to vector<1x256xf32>
    %9 = vector.broadcast %7 : vector<16x1xf32> to vector<16x256xf32>
    %10 = vector.broadcast %8 : vector<1x256xf32> to vector<16x256xf32>
    %11 = arith.mulf %9, %10 : vector<16x256xf32>
    %12 = arith.addf %6, %11 : vector<16x256xf32>
    %cst = arith.constant 0.000000e+00 : f32
    %13 = vector.broadcast %cst : f32 to vector<16x256xf32>
    %14 = arith.maximumf %12, %13 : vector<16x256xf32>
    %c0_3 = arith.constant 0 : index
    %c0_4 = arith.constant 0 : index
    %15 = vector.load %arg3[%c0_3, %c0_4] : memref<16x16xf32, #tpu.memory_space<vmem>>, vector<16x16xf32>
    %cst_5 = arith.constant dense<0.000000e+00> : vector<16x256xf32>
    %16 = tpu.matmul %15, %14, %cst_5 {dimension_numbers = #tpu.dot_dimension_numbers<[1], [0], [0], [1], [0, 0, 1, 1], [], []>} : vector<16x16xf32>, vector<16x256xf32>, vector<16x256xf32> -> vector<16x256xf32>
    %cst_6 = arith.constant 0.000000e+00 : f32
    %17 = vector.broadcast %cst_6 : f32 to vector<16x256xf32>
    %18 = arith.maximumf %16, %17 : vector<16x256xf32>
    %c0_7 = arith.constant 0 : index
    %c0_8 = arith.constant 0 : index
    %19 = vector.load %arg4[%c0_7, %c0_8] : memref<16x1xf32, #tpu.memory_space<vmem>>, vector<16x1xf32>
    %20 = vector.broadcast %19 : vector<16x1xf32> to vector<16x256xf32>
    %21 = arith.mulf %20, %18 : vector<16x256xf32>
    %cst_9 = arith.constant dense<0.000000e+00> : vector<256xf32>
    %22 = vector.multi_reduction <add>, %21, %cst_9 [0] : vector<16x256xf32> to vector<256xf32>
    %23 = vector.shape_cast %22 : vector<256xf32> to vector<1x256xf32>
    %c0_10 = arith.constant 0 : index
    %c0_11 = arith.constant 0 : index
    %24 = vector.load %arg5[%c0_10, %c0_11] : memref<1x256xf32, #tpu.memory_space<vmem>>, vector<1x256xf32>
    tpu.vector_store %arg5[%c0_10, %c0_11], %23 {strides = array<i32>} : memref<1x256xf32, #tpu.memory_space<vmem>>, vector<1x256xf32>,
    return
  }
  func.func @transform_0(%arg0: i32) -> (i32, i32) {
    %c0_i32 = arith.constant 0 : i32
    %c0_i32_0 = arith.constant 0 : i32
    return %c0_i32, %arg0 : i32, i32
  }
  func.func @transform_1(%arg0: i32) -> (i32, i32) {
    %c0_i32 = arith.constant 0 : i32
    %c0_i32_0 = arith.constant 0 : i32
    %c0_i32_1 = arith.constant 0 : i32
    return %c0_i32, %c0_i32_0 : i32, i32
  }
  func.func @transform_2(%arg0: i32) -> (i32, i32) {
    %c0_i32 = arith.constant 0 : i32
    %c0_i32_0 = arith.constant 0 : i32
    %c0_i32_1 = arith.constant 0 : i32
    return %c0_i32, %c0_i32_0 : i32, i32
  }
  func.func @transform_3(%arg0: i32) -> (i32, i32) {
    %c0_i32 = arith.constant 0 : i32
    %c0_i32_0 = arith.constant 0 : i32
    %c0_i32_1 = arith.constant 0 : i32
    return %c0_i32, %c0_i32_0 : i32, i32
  }
  func.func @transform_4(%arg0: i32) -> (i32, i32) {
    %c0_i32 = arith.constant 0 : i32
    %c0_i32_0 = arith.constant 0 : i32
    return %c0_i32, %arg0 : i32, i32
  }
}

</mosaic_0001>

<bundles_post_ra>
// kernel: quine_image_approx_forward.1
= control target key start
LH: loop header
LB: loop body
LE: loop exit
PB: predicated region body
PF: predicated region fallthrough
CT: control target
= control target key end

     0   :  { %v289_v1 = vmov 1   ;;  %v290_v2 = vmov 0   ;;  %s361_s0 = inlined_call_operand.vmem [shape: f32[2,256], index: 0, kind: input, shape index: {}]   ;;  %s362_s1 = inlined_call_operand.vmem [shape: f32[16,2], index: 1, kind: input, shape index: {}]   ;;  %s363_s2 = inlined_call_operand.vmem [shape: f32[16,16], index: 2, kind: input, shape index: {}]   ;;  %s364_s3 = inlined_call_operand.vmem [shape: f32[16,1], index: 3, kind: input, shape index: {}]   ;;  %s365_s4 = inlined_call_operand.hbm [shape: f32[1,256], index: 4, kind: output, shape index: {}]  }
   0x1   :  { %v19_v0 = vld [vmem:[%s362_s1] sm:$0xff]  ;;  %263 = vset.pattern.permute.xlu1 %v289_v1  ;;  %262 = vset.pattern.permute.xlu0 %v290_v2 }
   0x2   :  { %9 = vsyncpa [#allocation3], 0  ;;  %55 = vperm.xlu1 %263, %v19_v0   ;;  %23 = vperm.xlu0 %262, %v19_v0   ;;  %v20_v3 = vld [vmem:[%s362_s1 + $0x8] sm:$0xff]  ;;  %v182_v4 = vld [vmem:[%s364_s3] sm:$0xff]  ;;  %v291_v5 = vmov 0.0   ;;  %v32_v7 = vlaneseq  ;;  %vm94_vm0 = vcmask 130048  }
   0x3   :  { %165 = vmatprep.mubr.f32.mxu0 %v291_v5  ;;  %171 = vmatprep.mubr.f32.mxu1 %v291_v5  ;;  %v183_v6 = vld [vmem:[%s364_s3 + $0x8] sm:$0xff]  ;;  %v18_v13 = vld [vmem:[%s361_s0] sm:$0xf] }
   0x4   :  { %v332_v8 = vshrl.u32 %v32_v7, 7  ;;  %v92_v44 = vld [vmem:[%s363_s2] sm:$0xff]  ;;  %v93_v45 = vld [vmem:[%s363_s2 + $0x8] sm:$0xff]  ;;  %s293_s2 = smov [#allocation2]   ;;  %vm232_vm1 = vcmp.lt.s32.totalorder %v32_v7, 256 }
   0x5   :  { %s241_s26 = sshll.u32 %s293_s2, 4  ;;  %s242_s26 = int_to_ptr.vmem [resolvable:$true] %s241_s26 }
   0x6   :  { %59 = vperm.xlu1 %263, %v20_v3   ;;  %28 = vperm.xlu0 %262, %v20_v3   ;;  %v64_v9 = vsub.s32 1, %v332_v8  ;;  %v68_v10 = vsub.s32 3, %v332_v8  ;;  %v34_v11 = vsub.s32 0, %v332_v8  ;;  %v38_v12 = vsub.s32 2, %v332_v8  ;;  %s265_s27 = scalar_lea.vmem %s242_s26, 32  ;;  %p270_p1 = scmp.lt.s32.totalorder %s242_s26, %s242_s26 }
   0x7   :  { %p266_p0 = scmp.ne.s32.totalorder %s242_s26, %s265_s27  ;;  %p271_p2 = scmp.lt.s32.totalorder %s265_s27, %s265_s27 }
   0x8   :  { %v65_v14 = vrot.slane %v18_v13, %v64_v9  ;;  %v69_v15 = vrot.slane %v18_v13, %v68_v10  ;;  %v35_v16 = vrot.slane %v18_v13, %v34_v11  ;;  %v39_v17 = vrot.slane %v18_v13, %v38_v12 }
   0x9   :  { %p272_p3 = por %p271_p2, %p270_p1 }
   0xa   :  { %186 = vperm.xlu0 %262, %v182_v4   ;;  %264 = vset.pattern.permute.xlu1 %v290_v2  ;;  %v75_v18 = vrot.slane %v65_v14, %v64_v9  ;;  %v79_v19 = vrot.slane %v69_v15, %v64_v9  ;;  %v45_v20 = vrot.slane %v35_v16, %v34_v11  ;;  %v292_v2 = vmov 1966171168  }
   0xb   :  { %191 = vperm.xlu1 %264, %v183_v6   ;;  %v49_v21 = vrot.slane %v39_v17, %v34_v11  ;;  %v216_v3 = vunpack.c.l.s4 %v292_v2  ;;  %p273_p4 = pnand %p272_p3, %p266_p0 }
   0xd   :  { %v217_v10 = vunpack.c.0.s8 %v216_v3 }
   0xf   :  { %v220_v15 = vsub.s32 %v217_v10, %v332_v8 }
  0x81   :  { %v56_v22 = vpop.permute.xlu1 %55  ;;  %v24_v23 = vpop.permute.xlu0 %23 }
  0x82   :  { %v80_v24 = vmul.f32 %v75_v18, %v56_v22  ;;  %v81_v25 = vmul.f32 %v79_v19, %v56_v22  ;;  %v50_v26 = vmul.f32 %v45_v20, %v24_v23  ;;  %v51_v27 = vmul.f32 %v49_v21, %v24_v23 }
  0x84   :  { %v84_v28 = vadd.f32 %v80_v24, %v50_v26  ;;  %v85_v29 = vadd.f32 %v81_v25, %v51_v27 }
  0x85   :  { %v60_v30 = vpop.permute.xlu1 %59  ;;  %v29_v31 = vpop.permute.xlu0 %28 }
  0x86   :  { %v82_v32 = vmul.f32 %v75_v18, %v60_v30  ;;  %v83_v33 = vmul.f32 %v79_v19, %v60_v30  ;;  %v52_v34 = vmul.f32 %v45_v20, %v29_v31  ;;  %v53_v35 = vmul.f32 %v49_v21, %v29_v31 }
  0x87   :  { %v89_v38 = vmax.f32 %v85_v29, 0.0  ;;  %v88_v40 = vmax.f32 %v84_v28, 0.0 }
  0x88   :  { %v86_v36 = vadd.f32 %v82_v32, %v52_v34  ;;  %v87_v37 = vadd.f32 %v83_v33, %v53_v35 }
  0x89   :  { %v187_v53 = vpop.permute.xlu0 %186 }
  0x8a   :  { %v91_v39 = vmax.f32 %v87_v37, 0.0  ;;  %v90_v41 = vmax.f32 %v86_v36, 0.0  ;;  %v192_v46 = vpop.permute.xlu1 %191 }
  0x8c   :  { %v251_v42 = vpack.c.bf16 %v91_v39, %v89_v38  ;;  %v253_v43 = vpack.c.bf16 %v90_v41, %v88_v40 }
  0x8e   :  { %252 = vmatprep.subr.bf16.mxu0 %v251_v42  ;;  %255 = vmatprep.subr.bf16.mxu1 %v251_v42 }
  0x8f   :  { %254 = vmatpush1.bf16.msra.mxu0 %v253_v43  ;;  %256 = vmatpush1.bf16.msra.mxu1 %v253_v43 }
  0x92   :  { %249 = vmatmul.mubr.msk.f32.vlgmr.msra.gmra.mrb[0].mxu0 %vm94_vm0, %v92_v44  ;;  %250 = vmatmul.mubr.msk.f32.vlgmr.msra.gmra.mrb[0].mxu1 %vm94_vm0, %v93_v45 }
 0x165   :  { %v167_v47 = vpop.f32.mrb[0].mxu0  ;;  %v173_v48 = vpop.f32.mrb[0].mxu1 }
 0x166   :  { %v178_v49 = vmax.f32 %v167_v47, 0.0  ;;  %v180_v50 = vmax.f32 %v173_v48, 0.0  ;;  %v169_v51 = vpop.f32.mrb[1].mxu0  ;;  %v175_v52 = vpop.f32.mrb[1].mxu1 }
 0x167   :  { %v179_v54 = vmax.f32 %v169_v51, 0.0  ;;  %v181_v55 = vmax.f32 %v175_v52, 0.0 }
 0x168   :  { %v194_v56 = vmul.f32 %v187_v53, %v178_v49  ;;  %v196_v57 = vmul.f32 %v192_v46, %v180_v50 }
 0x169   :  { %v195_v58 = vmul.f32 %v187_v53, %v179_v54  ;;  %v197_v59 = vmul.f32 %v192_v46, %v181_v55 }
 0x16a   :  { %v198_v60 = vadd.f32 %v196_v57, %v194_v56 }
 0x16b   :  { %v205_v61 = vadd.f32 %v197_v59, %v195_v58 }
 0x16c   :  { %v199_v62 = vrot.slane %v198_v60, 4 }
 0x16d   :  { %v206_v63 = vrot.slane %v205_v61, 4 }
 0x16e   :  { %v200_v0 = vadd.f32 %v199_v62, %v198_v60 }
 0x16f   :  { %v207_v1 = vadd.f32 %v206_v63, %v205_v61 }
 0x170   :  { %v201_v4 = vrot.slane %v200_v0, 2 }
 0x171   :  { %v208_v5 = vrot.slane %v207_v1, 2 }
 0x172   :  { %v202_v6 = vadd.f32 %v201_v4, %v200_v0 }
 0x173   :  { %v209_v9 = vadd.f32 %v208_v5, %v207_v1 }
 0x174   :  { %v203_v11 = vrot.slane %v202_v6, 1 }
 0x175   :  { %v210_v12 = vrot.slane %v209_v9, 1 }
 0x176   :  { %v204_v13 = vadd.f32 %v203_v11, %v202_v6 }
 0x177   :  { %v211_v14 = vadd.f32 %v210_v12, %v209_v9 }
 0x179   :  { %v214_v16 = vcombine.low %v204_v13, %v211_v14 }
 0x17b   :  { %v221_v17 = vrot.slane %v214_v16, %v220_v15 }
 0x17d   :  { %v228_v18 = vrot.slane %v221_v17, %v220_v15 }
 0x17f   :  { %234 = vst.msk [vmem:[#allocation2] sm:$0x3] %vm232_vm1, %v228_v18 }
 0x180   :  { %276 = shalt.err (!%p273_p4)
}
 0x181   :  { %s277_s30 = scalar_lea.hbm %s365_s4, 32 }
 0x182   :  { %p278_p5 = scmp.ne.s32.totalorder %s365_s4, %s277_s30  ;;  %p281_p6 = scmp.lt.u32.totalorder %s277_s30, %s365_s4 }
 0x184   :  { %p283_p7 = pnand %p281_p6, %p278_p5 }
 0x186   :  { %286 = shalt.err (!%p283_p7)
}
 0x187   :  { %244 = dma.vmem_to_hbm [thread:$0]  %s242_s26, 32, %s365_s4, [#allocation3]  }
 0x188   :  { %287 = dma.done.wait [#allocation3], 32  }
 0x189   :  { %288 = vsyncadd [#allocation3], 4294967264 }
 0x18a   :  { %248 = vsyncpa [#allocation3], 1 }

</bundles_post_ra>
